<compile_context>
chip_gen: v6e
topology: v6e:2x2x1
jax: 0.10.0
libtpu: 0.0.40
codegen_flags: <defaults>
</compile_context>

<pallas_src>
import functools

import jax
import jax.numpy as jnp
from jax.experimental import pallas as pl
from jax.experimental.pallas import tpu as pltpu

LANES = 128
MAX_BLOCK_ROWS = 4096   # (4096,128) f32 = 2 MiB/buffer, double-buffered = 4 MiB


def _neg_log_sum_kernel(x_ref, o_ref, *, rows, block_rows, n_tiles):
    i = pl.program_id(0)

    @pl.when(i == 0)
    def _():
        o_ref[...] = jnp.zeros(o_ref.shape, o_ref.dtype)

    x = x_ref[...].astype(jnp.float32)   # upcast in-kernel (bf16 inputs ok)

    def accumulate(xv):
        # == torch.log(torch.clamp(x, min=0.01))
        logs = jnp.log(jnp.maximum(xv, jnp.float32(0.01)))
        # Sublane-only reduce; lanes stay resident in the output accumulator.
        o_ref[...] += jnp.sum(logs, axis=0, keepdims=True)

    if rows % block_rows != 0:
        # Hot/cold split: only the final (partial) tile carries garbage rows.
        last = n_tiles - 1

        @pl.when(i != last)
        def _():
            accumulate(x)

        @pl.when(i == last)
        def _():
            row_ids = last * block_rows + jax.lax.broadcasted_iota(
                jnp.int32, (block_rows, LANES), 0)
            # Mask BEFORE the log so stale/NaN garbage never reaches it.
            accumulate(jnp.where(row_ids < rows, x, jnp.float32(1.0)))
    else:
        accumulate(x)


def negative_log_sum(x, *, max_block_rows=MAX_BLOCK_ROWS):
    """Pallas implementation of NegativeLogSumCriterion.forward."""
    assert max_block_rows % 8 == 0, "block rows must stay a multiple of 8"

    x_flat = jnp.ravel(x)
    n = x_flat.shape[0]
    if n == 0:
        return jnp.float32(0.0)   # -sum over empty = 0

    # Lane-misaligned tail (<=127 elements): do it in plain JAX instead of
    # materializing a padded copy of the whole array.
    rem = n % LANES
    tail_sum = jnp.float32(0.0)
    if rem:
        tail = x_flat[n - rem:].astype(jnp.float32)
        tail_sum = jnp.sum(jnp.log(jnp.maximum(tail, jnp.float32(0.01))))
        x_flat = x_flat[: n - rem]

    rows = x_flat.shape[0] // LANES
    if rows == 0:
        return -tail_sum

    x2d = x_flat.reshape(rows, LANES)

    # Full extent when it fits in one block (no masking needed), otherwise a
    # large multiple-of-8 block; only the last partial tile gets masked.
    block_rows = rows if rows <= max_block_rows else max_block_rows
    n_tiles = pl.cdiv(rows, block_rows)

    kernel = functools.partial(
        _neg_log_sum_kernel,
        rows=rows, block_rows=block_rows, n_tiles=n_tiles)

    partials = pl.pallas_call(
        kernel,
        out_shape=jax.ShapeDtypeStruct((1, LANES), jnp.float32),
        grid_spec=pltpu.PrefetchScalarGridSpec(
            num_scalar_prefetch=0,
            grid=(n_tiles,),
            in_specs=[pl.BlockSpec((block_rows, LANES), lambda i: (i, 0))],
            out_specs=pl.BlockSpec((1, LANES), lambda i: (0, 0)),
        ),
        compiler_params=pltpu.CompilerParams(
            dimension_semantics=("arbitrary",),
            vmem_limit_bytes=32 << 20),
    )(x2d)

    # Single cross-lane reduce + negate on a tiny array, outside the kernel.
    return -(jnp.sum(partials) + tail_sum)


def _reference(x):
    return -jnp.sum(jnp.log(jnp.maximum(x.astype(jnp.float32), 0.01)))


if __name__ == "__main__":
    key = jax.random.PRNGKey(0)
    k1, k2, k3 = jax.random.split(key, 3)

    # Primary: NCHW-like input from the module spec (lane-aligned, one tile).
    x1 = jax.random.uniform(k1, (2, 4, 16, 16), dtype=jnp.float32,
                            minval=-0.5, maxval=2.0)
    out1 = jax.block_until_ready(negative_log_sum(x1))
    assert jnp.allclose(out1, _reference(x1), rtol=1e-5, atol=1e-4), (
        out1, _reference(x1))

    # Lane-misaligned input (945 elements) -> exercises the plain-JAX tail path.
    x2 = jax.random.uniform(k2, (3, 5, 7, 9), dtype=jnp.float32,
                            minval=-0.5, maxval=2.0)
    out2 = jax.block_until_ready(negative_log_sum(x2))
    assert jnp.allclose(out2, _reference(x2), rtol=1e-5, atol=1e-4), (
        out2, _reference(x2))

    # Multi-tile + partial final tile + tail (small block override for testing).
    x3 = jax.random.uniform(k3, (4000,), dtype=jnp.float32,
                            minval=-0.5, maxval=2.0)
    out3 = jax.block_until_ready(negative_log_sum(x3, max_block_rows=8))
    assert jnp.allclose(out3, _reference(x3), rtol=1e-5, atol=1e-4), (
        out3, _reference(x3))

    print("KERNEL_OK")
</pallas_src>

<mosaic_0001>
module attributes {stable_mosaic.version = 11 : i64} {
  func.func @_neg_log_sum_kernel(%arg0: i32, %arg1: memref<16x128xf32, #tpu.memory_space<vmem>>, %arg2: memref<1x128xf32, #tpu.memory_space<vmem>>) attributes {dimension_semantics = [#tpu.dimension_semantics<arbitrary>], iteration_bounds = array<i64: 1>, scalar_prefetch = 0 : i64, scratch_operands = 0 : i64, tpu.core_type = #tpu.core_type<tc>, window_params = [{transform_indices = @transform_0, window_bounds = array<i64: 16, 128>}, {pipeline_mode = #tpu.pipeline_mode<synchronous>, transform_indices = @transform_1, window_bounds = array<i64: 1, 128>}]} {
    %c0_i32 = arith.constant 0 : i32
    %0 = arith.cmpi eq, %arg0, %c0_i32 : i32
    %1 = arith.extui %0 : i1 to i32
    %c0_i32_0 = arith.constant 0 : i32
    %2 = arith.cmpi ne, %1, %c0_i32_0 : i32
    scf.if %2 {
      %cst_7 = arith.constant 0.000000e+00 : f32
      %12 = vector.broadcast %cst_7 : f32 to vector<1x128xf32>
      %c0_8 = arith.constant 0 : index
      %c0_9 = arith.constant 0 : index
      %13 = vector.load %arg2[%c0_8, %c0_9] : memref<1x128xf32, #tpu.memory_space<vmem>>, vector<1x128xf32>
      tpu.vector_store %arg2[%c0_8, %c0_9], %12 {strides = array<i32>} : memref<1x128xf32, #tpu.memory_space<vmem>>, vector<1x128xf32>,
    } else {
    }
    %c0 = arith.constant 0 : index
    %c0_1 = arith.constant 0 : index
    %3 = vector.load %arg1[%c0, %c0_1] : memref<16x128xf32, #tpu.memory_space<vmem>>, vector<16x128xf32>
    %cst = arith.constant 0.00999999977 : f32
    %4 = vector.broadcast %cst : f32 to vector<16x128xf32>
    %5 = arith.maximumf %3, %4 : vector<16x128xf32>
    %6 = math.log %5 : vector<16x128xf32>
    %c0_2 = arith.constant 0 : index
    %c0_3 = arith.constant 0 : index
    %7 = vector.load %arg2[%c0_2, %c0_3] : memref<1x128xf32, #tpu.memory_space<vmem>>, vector<1x128xf32>
    %cst_4 = arith.constant dense<0.000000e+00> : vector<128xf32>
    %8 = vector.multi_reduction <add>, %6, %cst_4 [0] : vector<16x128xf32> to vector<128xf32>
    %9 = vector.shape_cast %8 : vector<128xf32> to vector<1x128xf32>
    %10 = arith.addf %7, %9 : vector<1x128xf32>
    %c0_5 = arith.constant 0 : index
    %c0_6 = arith.constant 0 : index
    %11 = vector.load %arg2[%c0_5, %c0_6] : memref<1x128xf32, #tpu.memory_space<vmem>>, vector<1x128xf32>
    tpu.vector_store %arg2[%c0_5, %c0_6], %10 {strides = array<i32>} : memref<1x128xf32, #tpu.memory_space<vmem>>, vector<1x128xf32>,
    return
  }
  func.func @transform_0(%arg0: i32) -> (i32, i32) {
    %c0_i32 = arith.constant 0 : i32
    %c0_i32_0 = arith.constant 0 : i32
    return %arg0, %c0_i32 : i32, i32
  }
  func.func @transform_1(%arg0: i32) -> (i32, i32) {
    %c0_i32 = arith.constant 0 : i32
    %c0_i32_0 = arith.constant 0 : i32
    %c0_i32_1 = arith.constant 0 : i32
    return %c0_i32, %c0_i32_0 : i32, i32
  }
}

</mosaic_0001>

<bundles_post_ra>
// kernel: tpu_custom_call.1
= control target key start
LH: loop header
LB: loop body
LE: loop exit
PB: predicated region body
PF: predicated region fallthrough
CT: control target
= control target key end

     0   :  { %6 = vsyncpa [#allocation3], 0  ;;  %s135_s0 = inlined_call_operand.hbm [shape: f32[16,128], index: 0, kind: input, shape index: {}]   ;;  %s136_s1 = inlined_call_operand.hbm [shape: f32[1,128], index: 1, kind: output, shape index: {}]  }
   0x1   :  { %7 = vsyncpa [#allocation4], 0  ;;  %s114_s6 = smov [#allocation2]  }
   0x2   :  { %s13_s7 = sshll.u32 %s114_s6, 4  ;;  %s14_s7 = int_to_ptr.vmem [resolvable:$true] %s13_s7 }
   0x3   :  { %s78_s8 = scalar_lea.vmem %s14_s7, 256  ;;  %p83_p1 = scmp.lt.s32.totalorder %s14_s7, %s14_s7 }
   0x4   :  { %p79_p0 = scmp.ne.s32.totalorder %s14_s7, %s78_s8  ;;  %p84_p2 = scmp.lt.s32.totalorder %s78_s8, %s78_s8 }
   0x6   :  { %p85_p3 = por %p84_p2, %p83_p1 }
   0x8   :  { %p86_p4 = pnand %p85_p3, %p79_p0 }
   0xa   :  { %89 = shalt.err (!%p86_p4)
}
   0xb   :  { %s115_s9 = smov 128   ;;  %s116_s10 = smov 8  }
   0xc   :  { %19 = dma.hbm_to_vmem [thread:$0]  %s135_s0, 256, %s14_s7, [#allocation3], %s115_s9, %s115_s9, %s116_s10  }
   0xd   :  { %110 = dma.done.wait [#allocation3], 256  }
   0xe   :  { %111 = vsyncadd [#allocation3], 4294967040  ;;  %v117_v0 = vmov 0.0   ;;  %v28_v1 = vld [vmem:[#allocation2] sm:$0xff]  ;;  %v29_v2 = vld [vmem:[#allocation2 + $0x8] sm:$0xff]  ;;  %s118_s0 = smov [#allocation5]  }
   0xf   :  { %27 = vst [vmem:[#allocation5] sm:$0x1] %v117_v0  ;;  %v30_v3 = vmax.f32 %v28_v1, 0.01  ;;  %v31_v4 = vmax.f32 %v29_v2, 0.01 }
  0x10   :  { %s52_s13 = sshll.u32 %s118_s0, 4  ;;  %s53_s13 = int_to_ptr.vmem [resolvable:$true] %s52_s13 }
  0x11   :  { %66 = vlog2.f32 %v30_v3  ;;  %s90_s14 = scalar_lea.vmem %s53_s13, 16  ;;  %s94_s15 = scalar_lea.vmem %s53_s13, 32 }
  0x12   :  { %68 = vlog2.f32 %v31_v4  ;;  %p91_p5 = scmp.ne.s32.totalorder %s53_s13, %s90_s14  ;;  %p95_p6 = scmp.lt.s32.totalorder %s53_s13, %s53_s13 }
  0x13   :  { %p96_p7 = scmp.lt.s32.totalorder %s94_s15, %s90_s14 }
  0x15   :  { %p97_p8 = por %p96_p7, %p95_p6 }
  0x16   :  { %v36_v15 = vld [vmem:[#allocation5] sm:$0x1] }
  0x17   :  { %p98_p9 = pnand %p97_p8, %p91_p5 }
  0x1e   :  { %v67_v5 = vpop.eup %66 }
  0x1f   :  { %v69_v6 = vpop.eup %68  ;;  %v33_v7 = vmul.f32 0.6931472, %v67_v5 }
  0x20   :  { %v35_v8 = vmul.f32 0.6931472, %v69_v6 }
  0x22   :  { %v37_v9 = vadd.f32 %v35_v8, %v33_v7 }
  0x24   :  { %v38_v10 = vrot.slane %v37_v9, 4 }
  0x26   :  { %v39_v11 = vadd.f32 %v38_v10, %v37_v9 }
  0x28   :  { %v40_v12 = vrot.slane %v39_v11, 2 }
  0x2a   :  { %v41_v13 = vadd.f32 %v40_v12, %v39_v11 }
  0x2c   :  { %v42_v14 = vrot.slane %v41_v13, 1 }
  0x2e   :  { %v43_v16 = vadd.f32 %v42_v14, %v41_v13 }
  0x30   :  { %v44_v17 = vadd.f32 %v43_v16, %v36_v15 }
  0x32   :  { %45 = vst [vmem:[#allocation5] sm:$0x1] %v44_v17 }
  0x33   :  { %101 = shalt.err (!%p98_p9)
}
  0x34   :  { %55 = dma.vmem_to_hbm [thread:$0]  %s53_s13, 16, %s136_s1, [#allocation4]  }
  0x35   :  { %112 = dma.done.wait [#allocation4], 16  }
  0x36   :  { %113 = vsyncadd [#allocation4], 4294967280 }
  0x37   :  { %59 = vsyncpa [#allocation3], 1 }
  0x38   :  { %60 = vsyncpa [#allocation4], 1 }

</bundles_post_ra>
